<compile_context>
chip_gen: v7x
topology: tpu7x:2x2x1
jax: 0.10.0
libtpu: 0.0.40
codegen_flags: <defaults>
</compile_context>

<pallas_src>
import functools

import jax
import jax.numpy as jnp
from jax.experimental import pallas as pl
from jax.experimental.pallas import tpu as pltpu

_LANE_TILE = 1024  # lane-tile width for the batched (gridded) path


def _project(a, b, xy_in, z):
    """Folded projection + pixel mapping: a * (p / z) + b, shared 1/z for x & y."""
    r = pl.reciprocal(z, approx=True)       # EUP push (otherwise-idle slot)
    inv_z = r * (2.0 - z * r)                # one Newton step -> ~full f32 accuracy
    return a * (xy_in * inv_z) + b           # (2, T) * (1, T) broadcast


def _proj_single_kernel(a, b, inv_n, xy_in_ref, z_ref, gt_ref, loss_ref, xy_ref):
    # Single whole-array block (no grid): compute, store xy, write scalar loss.
    xy = _project(a, b, xy_in_ref[...], z_ref[...])
    xy_ref[...] = xy
    loss_ref[0, 0] = jnp.sum(jnp.abs(xy - gt_ref[...])) * inv_n


def _proj_tiled_kernel(a, b, inv_n, xy_in_ref, z_ref, gt_ref, loss_ref, xy_ref):
    # Gridded path: one 1024-lane tile per step; loss_ref is a resident SMEM
    # scalar accumulator (constant block index across the grid axis).
    @pl.when(pl.program_id(0) == 0)
    def _():
        loss_ref[0, 0] = 0.0

    xy = _project(a, b, xy_in_ref[...], z_ref[...])
    xy_ref[...] = xy
    loss_ref[0, 0] += inv_n * jnp.sum(jnp.abs(xy - gt_ref[...]))
    # TODO(synk): on v7x, switch to per-tile partial-sum outputs with a
    # "parallel" grid axis so both TensorCores split the work.


def projection_loss(xyz, gt, *, f, c, image_size=1024.0):
    """Pallas ProjectionLoss forward.

    xyz: (N, 3) float32 camera-space points. N may be B*21 for many hands /
         frames packed into one call (the batched fast path).
    gt : (N, 2) float32 ground-truth pixel keypoints.
    f, c, image_size: static Python numbers (baked into the kernel).
    Returns (mean L1 loss scalar, projected pixel xy of shape (N, 2)).
    """
    N = xyz.shape[0]
    assert xyz.shape == (N, 3) and gt.shape == (N, 2)

    # Fold the NDC -> pixel affine into the projection constants (host-side,
    # static): xy_pix = a * (p / z) + b.
    a = 0.5 * float(f) * float(image_size)
    b = (0.5 * float(c) + 0.5) * float(image_size)
    inv_n = 1.0 / (2.0 * N)

    # Lane-dense point axis, padded to a vreg / tile multiple.
    n_pad = max(128, -(-N // 128) * 128)
    if n_pad > _LANE_TILE:
        n_pad = -(-N // _LANE_TILE) * _LANE_TILE
        tile = _LANE_TILE
    else:
        tile = n_pad
    num_tiles = n_pad // tile
    pad = n_pad - N

    xyz_f = jnp.asarray(xyz, jnp.float32)
    gt_f = jnp.asarray(gt, jnp.float32)
    # Pad so that pad lanes contribute exactly 0 to the loss (no runtime mask):
    #   x,y pad = 0, z pad = 1  ->  projected pad = b ;  gt pad = b.
    xy_in_t = jnp.pad(xyz_f[:, :2].T, ((0, 0), (0, pad)))                     # (2, n_pad)
    z_t = jnp.pad(xyz_f[:, 2:].T, ((0, 0), (0, pad)), constant_values=1.0)    # (1, n_pad)
    gt_t = jnp.pad(gt_f.T, ((0, 0), (0, pad)), constant_values=b)             # (2, n_pad)

    out_shape = (jax.ShapeDtypeStruct((1, 1), jnp.float32),
                 jax.ShapeDtypeStruct((2, n_pad), jnp.float32))

    if num_tiles == 1:
        # Single block: no grid, whole arrays live in VMEM.
        loss2d, xy_t = pl.pallas_call(
            functools.partial(_proj_single_kernel, a, b, inv_n),
            out_shape=out_shape,
            in_specs=[pl.BlockSpec(memory_space=pltpu.MemorySpace.VMEM)] * 3,
            out_specs=(pl.BlockSpec(memory_space=pltpu.MemorySpace.SMEM),
                       pl.BlockSpec(memory_space=pltpu.MemorySpace.VMEM)),
            compiler_params=pltpu.CompilerParams(
                allow_input_fusion=[True, True, True]),
        )(xy_in_t, z_t, gt_t)
    else:
        # Batched: grid over 1024-lane tiles; loss accumulated in a resident
        # SMEM scalar output ("arbitrary" reduction axis).
        loss2d, xy_t = pl.pallas_call(
            functools.partial(_proj_tiled_kernel, a, b, inv_n),
            out_shape=out_shape,
            grid=(num_tiles,),
            in_specs=[pl.BlockSpec((2, tile), lambda i: (0, i)),
                      pl.BlockSpec((1, tile), lambda i: (0, i)),
                      pl.BlockSpec((2, tile), lambda i: (0, i))],
            out_specs=(pl.BlockSpec(memory_space=pltpu.MemorySpace.SMEM),
                       pl.BlockSpec((2, tile), lambda i: (0, i))),
            compiler_params=pltpu.CompilerParams(
                dimension_semantics=("arbitrary",),
                allow_input_fusion=[True, True, True]),
        )(xy_in_t, z_t, gt_t)

    # TODO(synk): consumers that can accept the lane-dense (2, N) layout should
    # take xy_t directly and skip this output-side slice + transpose.
    return loss2d[0, 0], xy_t[:, :N].T


def _reference(xyz, gt, f, c, image_size=1024.0):
    x, y, z = xyz[:, 0], xyz[:, 1], xyz[:, 2]
    xn = f * x / z + c
    yn = f * y / z + c
    xy = jnp.stack([xn, yn], axis=1)
    xy = (xy * 0.5 + 0.5) * image_size
    return jnp.mean(jnp.abs(xy - gt)), xy


if __name__ == "__main__":
    f_cam, c_cam = 1.5, 0.0
    key = jax.random.PRNGKey(0)
    k1, k2, k3, k4, k5, k6 = jax.random.split(key, 6)

    proj = jax.jit(projection_loss, static_argnames=("f", "c", "image_size"))

    # --- single hand: 21 keypoints (module-consistent shape) -> single-block path
    P = 21
    xy_plane = jax.random.normal(k1, (P, 2), jnp.float32) * 0.1
    z = jax.random.uniform(k2, (P, 1), jnp.float32, minval=0.3, maxval=1.0)
    xyz = jnp.concatenate([xy_plane, z], axis=1)                       # (P, 3)
    gt = jax.random.uniform(k3, (P, 2), jnp.float32, minval=0.0, maxval=1024.0)

    loss, xy = proj(xyz, gt, f=f_cam, c=c_cam, image_size=1024.0)
    jax.block_until_ready((loss, xy))
    ref_loss, ref_xy = _reference(xyz, gt, f_cam, c_cam)
    assert jnp.allclose(xy, ref_xy, rtol=1e-4, atol=1e-3), "xy mismatch (single)"
    assert jnp.allclose(loss, ref_loss, rtol=1e-4, atol=1e-3), "loss mismatch (single)"

    # --- batched: 64 hands x 21 keypoints packed onto the lane axis -> tiled/grid path
    B = 64
    N = B * P
    xy_plane_b = jax.random.normal(k4, (N, 2), jnp.float32) * 0.1
    z_b = jax.random.uniform(k5, (N, 1), jnp.float32, minval=0.3, maxval=1.0)
    xyz_b = jnp.concatenate([xy_plane_b, z_b], axis=1)                 # (N, 3)
    gt_b = jax.random.uniform(k6, (N, 2), jnp.float32, minval=0.0, maxval=1024.0)

    loss_b, xy_b = proj(xyz_b, gt_b, f=f_cam, c=c_cam, image_size=1024.0)
    jax.block_until_ready((loss_b, xy_b))
    ref_loss_b, ref_xy_b = _reference(xyz_b, gt_b, f_cam, c_cam)
    assert jnp.allclose(xy_b, ref_xy_b, rtol=1e-4, atol=1e-3), "xy mismatch (batched)"
    assert jnp.allclose(loss_b, ref_loss_b, rtol=1e-4, atol=1e-3), "loss mismatch (batched)"

    print("KERNEL_OK")
</pallas_src>

<mosaic_0001>
module attributes {stable_mosaic.version = 11 : i64} {
  func.func @_proj_single_kernel(%arg0: memref<2x128xf32, #tpu.memory_space<vmem>>, %arg1: memref<1x128xf32, #tpu.memory_space<vmem>>, %arg2: memref<2x128xf32, #tpu.memory_space<vmem>>, %arg3: memref<1x1xf32, #tpu.memory_space<smem>>, %arg4: memref<2x128xf32, #tpu.memory_space<vmem>>) attributes {dimension_semantics = [], scalar_prefetch = 0 : i64, scratch_operands = 0 : i64, tpu.core_type = #tpu.core_type<tc>} {
    %c0 = arith.constant 0 : index
    %c0_0 = arith.constant 0 : index
    %0 = vector.load %arg0[%c0, %c0_0] : memref<2x128xf32, #tpu.memory_space<vmem>>, vector<2x128xf32>
    %c0_1 = arith.constant 0 : index
    %c0_2 = arith.constant 0 : index
    %1 = vector.load %arg1[%c0_1, %c0_2] : memref<1x128xf32, #tpu.memory_space<vmem>>, vector<1x128xf32>
    %2 = tpu.reciprocal %1 {approx = true} : vector<1x128xf32> -> vector<1x128xf32>
    %3 = arith.mulf %1, %2 : vector<1x128xf32>
    %cst = arith.constant 2.000000e+00 : f32
    %4 = vector.broadcast %cst : f32 to vector<1x128xf32>
    %5 = arith.subf %4, %3 : vector<1x128xf32>
    %6 = arith.mulf %2, %5 : vector<1x128xf32>
    %7 = vector.broadcast %6 : vector<1x128xf32> to vector<2x128xf32>
    %8 = arith.mulf %0, %7 : vector<2x128xf32>
    %cst_3 = arith.constant 7.680000e+02 : f32
    %9 = vector.broadcast %cst_3 : f32 to vector<2x128xf32>
    %10 = arith.mulf %9, %8 : vector<2x128xf32>
    %cst_4 = arith.constant 5.120000e+02 : f32
    %11 = vector.broadcast %cst_4 : f32 to vector<2x128xf32>
    %12 = arith.addf %10, %11 : vector<2x128xf32>
    %c0_5 = arith.constant 0 : index
    %c0_6 = arith.constant 0 : index
    %13 = vector.load %arg4[%c0_5, %c0_6] : memref<2x128xf32, #tpu.memory_space<vmem>>, vector<2x128xf32>
    tpu.vector_store %arg4[%c0_5, %c0_6], %12 {strides = array<i32>} : memref<2x128xf32, #tpu.memory_space<vmem>>, vector<2x128xf32>,
    %c0_7 = arith.constant 0 : index
    %c0_8 = arith.constant 0 : index
    %14 = vector.load %arg2[%c0_7, %c0_8] : memref<2x128xf32, #tpu.memory_space<vmem>>, vector<2x128xf32>
    %15 = arith.subf %12, %14 : vector<2x128xf32>
    %16 = math.absf %15 : vector<2x128xf32>
    %17 = vector.shape_cast %16 : vector<2x128xf32> to vector<1x2x128xf32>
    %cst_9 = arith.constant dense<0.000000e+00> : vector<1xf32>
    %18 = vector.multi_reduction <add>, %17, %cst_9 [1, 2] : vector<1x2x128xf32> to vector<1xf32>
    %19 = vector.shape_cast %18 : vector<1xf32> to vector<1x1x1xf32>
    %20 = vector.extract %19[0, 0, 0] : f32 from vector<1x1x1xf32>
    %cst_10 = arith.constant 0.0238095243 : f32
    %21 = arith.mulf %20, %cst_10 : f32
    %c0_11 = arith.constant 0 : index
    %c0_12 = arith.constant 0 : index
    %22 = memref.load %arg3[%c0_11, %c0_12] : memref<1x1xf32, #tpu.memory_space<smem>>
    memref.store %21, %arg3[%c0_11, %c0_12] : memref<1x1xf32, #tpu.memory_space<smem>>
    return
  }
}

</mosaic_0001>

<bundles_post_ra>
// kernel: projection_loss.2
= control target key start
LH: loop header
LB: loop body
LE: loop exit
PB: predicated region body
PF: predicated region fallthrough
CT: control target
= control target key end

     0   :  { %s203_s0 = inlined_call_operand.vmem [shape: f32[2,21], index: 0, kind: input, shape index: {}]   ;;  %s204_s1 = inlined_call_operand.<no memory space> [shape: f32[], index: 1, kind: input, shape index: {}]   ;;  %s205_s2 = inlined_call_operand.vmem [shape: f32[2,21], index: 2, kind: input, shape index: {}]   ;;  %s206_s3 = inlined_call_operand.<no memory space> [shape: f32[], index: 3, kind: input, shape index: {}]   ;;  %s207_s4 = inlined_call_operand.vmem [shape: f32[1,21], index: 4, kind: input, shape index: {}]   ;;  %s208_s5 = inlined_call_operand.<no memory space> [shape: f32[], index: 5, kind: input, shape index: {}]   ;;  %s209_s6 = inlined_call_operand.hbm [shape: f32[1,1], index: 6, kind: output, shape index: {0}]   ;;  %s210_s7 = inlined_call_operand.vmem [shape: f32[2,128], index: 7, kind: output, shape index: {1}]  }
   0x1   :  { %v13_v0 = vstv %s206_s3  ;;  %v14_v1 = vstv %s208_s5  ;;  %v15_v2 = vstv %s204_s1 }
   0x2   :  { %v24_v3 = vlaneseq  ;;  %v23_v4 = vld [vmem:[%s205_s2] sm:$0x3] }
   0x3   :  { %16 = vsyncpa [#allocation18], 0  ;;  %v36_v7 = vld [vmem:[%s207_s4] sm:$0x1]  ;;  %vm81_vm3 = vcmask 1041408  }
   0x4   :  { %v25_v5 = vshrl.u32 %v24_v3, 7  ;;  %v30_v6 = vand.u32 127, %v24_v3  ;;  %v49_v8 = vld [vmem:[%s203_s0] sm:$0x3] }
   0x6   :  { %vm27_vm0 = vcmp.lt.s32.totalorder %v25_v5, 2  ;;  %vm32_vm1 = vcmp.lt.s32.totalorder %v30_v6, 21  ;;  %vm40_vm2 = vcmp.lt.s32.totalorder %v25_v5, 1  ;;  %v71_v19 = vsub.s32 0, %v25_v5 }
   0x7   :  { %v28_v9 = vsel %vm27_vm0, %v23_v4, %v13_v0  ;;  %v41_v10 = vsel %vm40_vm2, %v36_v7, %v14_v1  ;;  %v54_v11 = vsel %vm27_vm0, %v49_v8, %v15_v2 }
   0x8   :  { %v33_v12 = vsel %vm32_vm1, %v28_v9, %v13_v0  ;;  %v46_v13 = vsel %vm32_vm1, %v41_v10, %v14_v1  ;;  %v59_v14 = vsel %vm32_vm1, %v54_v11, %v15_v2 }
   0x9   :  { %35 = vst [vmem:[#allocation19] sm:$0x3] %v33_v12  ;;  %48 = vst [vmem:[#allocation20] sm:$0x1] %v46_v13 }
   0xa   :  { %61 = vst [vmem:[#allocation21] sm:$0x3] %v59_v14 }
  0x10   :  { %v63_v15 = vld [vmem:[#allocation20] sm:$0x1]  ;;  %v62_v21 = vld [vmem:[#allocation19] sm:$0x3] }
  0x11   :  { %115 = vrcp.f32 %v63_v15  ;;  %v78_v25 = vld [vmem:[#allocation21] sm:$0x3] }
  0x1b   :  { %v116_v16 = vpop.eup %115 }
  0x1c   :  { %v65_v17 = vmul.f32 %v116_v16, %v63_v15 }
  0x1e   :  { %v66_v18 = vsub.f32 2.0, %v65_v17 }
  0x20   :  { %v67_v20 = vmul.f32 %v116_v16, %v66_v18 }
  0x22   :  { %v72_v22 = vrot.slane %v67_v20, %v71_v19 }
  0x24   :  { %v74_v23 = vmul.f32 %v72_v22, %v62_v21 }
  0x26   :  { %v75_v24 = vmul.f32 768.0, %v74_v23 }
  0x28   :  { %v76_v26 = vadd.f32 512.0, %v75_v24 }
  0x2a   :  { %77 = vst [vmem:[%s210_s7] sm:$0x3] %v76_v26  ;;  %v79_v27 = vsub.f32 %v76_v26, %v78_v25  ;;  %s117_s7 = scalar_lea.hbm %s209_s6, 16 }
  0x2b   :  { %p118_p0 = scmp.ne.s32.totalorder %s209_s6, %s117_s7  ;;  %p121_p1 = scmp.lt.u32.totalorder %s117_s7, %s209_s6 }
  0x2c   :  { %v80_v28 = vand.u32 2147483647, %v79_v27 }
  0x2d   :  { %p123_p2 = pnand %p121_p1, %p118_p0 }
  0x2e   :  { %v82_v29 = vsel %vm81_vm3, %v80_v28, 0.0 }
  0x2f   :  { %83 = vadd.xlane.f32.xlu0 %v82_v29 }
  0xbc   :  { %v84_v30 = vpop.xlane.xlu0 %83 }
  0xbd   :  { %v85_v31 = vrot.slane %v84_v30, 4 }
  0xbf   :  { %v86_v32 = vadd.f32 %v85_v31, %v84_v30 }
  0xc1   :  { %v87_v33 = vrot.slane %v86_v32, 2 }
  0xc3   :  { %v88_v34 = vadd.f32 %v87_v33, %v86_v32 }
  0xc5   :  { %v89_v35 = vrot.slane %v88_v34, 1 }
  0xc7   :  { %v90_v36 = vadd.f32 %v89_v35, %v88_v34 }
  0xc9   :  { %112 = vpush %v90_v36 }
  0xfa   :  { %s113_s2 = spop %112 }
  0xfb   :  { %s92_s4 = smul.f32 0.023809524, %s113_s2 }
  0xfd   :  { %94 = sst [smem:[#allocation17]] %s92_s4 }
  0xfe   :  { %126 = shalt.err (!%p123_p2)
}
  0xff   :  { %s129_s17 = smov [#allocation17]  }
 0x100   :  { %102 = dma.smem_to_hbm %s129_s17, 16, %s209_s6, [#allocation18]  }
 0x101   :  { %127 = dma.done.wait [#allocation18], 16  }
 0x102   :  { %128 = vsyncadd [#allocation18], 4294967280 }
 0x103   :  { %110 = sfence }
 0x104   :  { %111 = vsyncpa [#allocation18], 1 }

</bundles_post_ra>
